<compile_context>
chip_gen: v7x
topology: tpu7x:2x2x1
jax: 0.10.0
libtpu: 0.0.40
codegen_flags: <defaults>
</compile_context>

<pallas_src>
import functools

import jax
import jax.numpy as jnp
from jax.experimental import pallas as pl
from jax.experimental.pallas import tpu as pltpu

IN_DIM = 28 * 28          # 784
IN_PAD = 7 * 128          # 896 (784 padded up to a lane multiple)
HID = 256
OUT_DIM = 1
NEG_SLOPE = 0.2


def _round_up(n, m):
    return ((n + m - 1) // m) * m


def _leaky_relu(x):
    return jnp.where(x > 0, x, NEG_SLOPE * x)


def discriminator_kernel(x_ref, w1_ref, b1_ref, w2_ref, b2_ref, w3_ref, b3_ref,
                         o_ref):
    # Layer 1: (TB, 896) x (896, 256) on the MXU, bf16 in / f32 accumulate.
    x = x_ref[...].astype(jnp.bfloat16)
    h1 = jnp.dot(x, w1_ref[...], preferred_element_type=jnp.float32) + b1_ref[...]
    h1 = _leaky_relu(h1)

    # Layer 2: (TB, 256) x (256, 256) on the MXU.
    h2 = jnp.dot(h1.astype(jnp.bfloat16), w2_ref[...],
                 preferred_element_type=jnp.float32) + b2_ref[...]
    h2 = _leaky_relu(h2)

    # Layer 3 (out_features = 1): an N=1 MXU matmul would use 1/256 of the
    # array and hit a masked 1-lane store path, so do it as a VPU multiply by
    # the broadcast weight row + cross-lane reduction (XLU), all in f32.
    h3 = jnp.sum(h2 * w3_ref[...], axis=-1, keepdims=True) + b3_ref[...]

    # Sigmoid: exp and the approximate reciprocal both run on the otherwise
    # idle EUP slot.
    o_ref[...] = pl.reciprocal(1.0 + jnp.exp(-h3), approx=True)


@functools.partial(jax.jit, static_argnames=("tb",))
def discriminator_linear(x, params, tb=1024):
    """x: (B, 784) float32 -> (B, 1) float32 in [0, 1]."""
    w1, b1, w2, b2, w3, b3 = params
    B = x.shape[0]

    # --- parameter prep (tiny, one-time per call) ----------------------------
    w1_p = jnp.pad(w1, ((0, IN_PAD - IN_DIM), (0, 0))).astype(jnp.bfloat16)
    w2_b = w2.astype(jnp.bfloat16)
    w3_row = w3.reshape(1, HID).astype(jnp.float32)   # (256, 1) -> (1, 256)
    b3_s = b3.reshape(1, 1).astype(jnp.float32)

    # --- batch tiling ---------------------------------------------------------
    tb_eff = min(tb, _round_up(B, 8))          # keep tiles small for small B
    b_pad = _round_up(B, tb_eff)
    x_p = jnp.pad(x, ((0, b_pad - B), (0, IN_PAD - IN_DIM)))

    grid = (b_pad // tb_eff,)
    resident = lambda i: (0, 0)                # same block every step -> stays in VMEM

    out = pl.pallas_call(
        discriminator_kernel,
        out_shape=jax.ShapeDtypeStruct((b_pad, OUT_DIM), jnp.float32),
        grid=grid,
        in_specs=[
            pl.BlockSpec((tb_eff, IN_PAD), lambda i: (i, 0)),   # x tile (streamed)
            pl.BlockSpec((IN_PAD, HID), resident),              # W1 (bf16, resident)
            pl.BlockSpec((1, HID), resident),                   # b1
            pl.BlockSpec((HID, HID), resident),                 # W2 (bf16, resident)
            pl.BlockSpec((1, HID), resident),                   # b2
            pl.BlockSpec((1, HID), resident),                   # W3 row
            pl.BlockSpec((1, 1), resident),                     # b3
        ],
        out_specs=pl.BlockSpec((tb_eff, OUT_DIM), lambda i: (i, 0)),
        compiler_params=pltpu.CompilerParams(
            dimension_semantics=("parallel",)),
    )(x_p, w1_p, b1, w2_b, b2, w3_row, b3_s)
    return out[:B]


def init_params(key):
    """PyTorch-style nn.Linear init (U(-k, k), k = 1/sqrt(fan_in)).

    Weights stored transposed: (in_features, out_features); biases (1, out)."""
    ks = jax.random.split(key, 6)

    def linear(kw, kb, fan_in, fan_out):
        bound = 1.0 / jnp.sqrt(jnp.float32(fan_in))
        w = jax.random.uniform(kw, (fan_in, fan_out), jnp.float32, -bound, bound)
        b = jax.random.uniform(kb, (1, fan_out), jnp.float32, -bound, bound)
        return w, b

    w1, b1 = linear(ks[0], ks[1], IN_DIM, HID)
    w2, b2 = linear(ks[2], ks[3], HID, HID)
    w3, b3 = linear(ks[4], ks[5], HID, OUT_DIM)
    return (w1, b1, w2, b2, w3, b3)


def reference_forward(x, params):
    """Pure-JAX reference mirroring the kernel's bf16-in / f32-accumulate math."""
    w1, b1, w2, b2, w3, b3 = params
    h = jnp.dot(x.astype(jnp.bfloat16), w1.astype(jnp.bfloat16),
                preferred_element_type=jnp.float32) + b1
    h = jnp.where(h > 0, h, NEG_SLOPE * h)
    h = jnp.dot(h.astype(jnp.bfloat16), w2.astype(jnp.bfloat16),
                preferred_element_type=jnp.float32) + b2
    h = jnp.where(h > 0, h, NEG_SLOPE * h)
    h3 = h @ w3 + b3
    return jax.nn.sigmoid(h3)


if __name__ == "__main__":
    key = jax.random.PRNGKey(0)
    k_param, k_x = jax.random.split(key)
    params = init_params(k_param)

    B = 13  # deliberately not a multiple of 8 to exercise the batch-padding path
    x = jax.random.normal(k_x, (B, IN_DIM), jnp.float32)

    out = jax.block_until_ready(discriminator_linear(x, params))
    ref = reference_forward(x, params)

    assert out.shape == (B, OUT_DIM)
    assert bool(jnp.all((out >= 0.0) & (out <= 1.0)))
    # bf16 matmul inputs + approx EUP reciprocal in the sigmoid -> loose-ish atol.
    assert jnp.allclose(out, ref, atol=5e-3, rtol=0.0), float(
        jnp.max(jnp.abs(out - ref)))

    print("KERNEL_OK")
</pallas_src>

<mosaic_0001>
module attributes {stable_mosaic.version = 11 : i64} {
  func.func @discriminator_kernel(%arg0: i32, %arg1: memref<16x896xf32, #tpu.memory_space<vmem>>, %arg2: memref<896x256xbf16, #tpu.memory_space<vmem>>, %arg3: memref<1x256xf32, #tpu.memory_space<vmem>>, %arg4: memref<256x256xbf16, #tpu.memory_space<vmem>>, %arg5: memref<1x256xf32, #tpu.memory_space<vmem>>, %arg6: memref<1x256xf32, #tpu.memory_space<vmem>>, %arg7: memref<1x1xf32, #tpu.memory_space<vmem>>, %arg8: memref<16x1xf32, #tpu.memory_space<vmem>>) attributes {dimension_semantics = [#tpu.dimension_semantics<parallel>], iteration_bounds = array<i64: 1>, scalar_prefetch = 0 : i64, scratch_operands = 0 : i64, tpu.core_type = #tpu.core_type<tc>, window_params = [{transform_indices = @transform_0, window_bounds = array<i64: 16, 896>}, {pipeline_mode = #tpu.pipeline_mode<synchronous>, transform_indices = @transform_1, window_bounds = array<i64: 896, 256>}, {pipeline_mode = #tpu.pipeline_mode<synchronous>, transform_indices = @transform_2, window_bounds = array<i64: 1, 256>}, {pipeline_mode = #tpu.pipeline_mode<synchronous>, transform_indices = @transform_3, window_bounds = array<i64: 256, 256>}, {pipeline_mode = #tpu.pipeline_mode<synchronous>, transform_indices = @transform_4, window_bounds = array<i64: 1, 256>}, {pipeline_mode = #tpu.pipeline_mode<synchronous>, transform_indices = @transform_5, window_bounds = array<i64: 1, 256>}, {pipeline_mode = #tpu.pipeline_mode<synchronous>, transform_indices = @transform_6, window_bounds = array<i64: 1, 1>}, {transform_indices = @transform_7, window_bounds = array<i64: 16, 1>}]} {
    %c0 = arith.constant 0 : index
    %c0_0 = arith.constant 0 : index
    %0 = vector.load %arg1[%c0, %c0_0] : memref<16x896xf32, #tpu.memory_space<vmem>>, vector<16x896xf32>
    %1 = arith.truncf %0 : vector<16x896xf32> to vector<16x896xbf16>
    %c0_1 = arith.constant 0 : index
    %c0_2 = arith.constant 0 : index
    %2 = vector.load %arg2[%c0_1, %c0_2] : memref<896x256xbf16, #tpu.memory_space<vmem>>, vector<896x256xbf16>
    %cst = arith.constant dense<0.000000e+00> : vector<16x256xf32>
    %3 = tpu.matmul %1, %2, %cst {dimension_numbers = #tpu.dot_dimension_numbers<[1], [0], [0], [1], [0, 0, 1, 1], [], []>} : vector<16x896xbf16>, vector<896x256xbf16>, vector<16x256xf32> -> vector<16x256xf32>
    %c0_3 = arith.constant 0 : index
    %c0_4 = arith.constant 0 : index
    %4 = vector.load %arg3[%c0_3, %c0_4] : memref<1x256xf32, #tpu.memory_space<vmem>>, vector<1x256xf32>
    %5 = vector.broadcast %4 : vector<1x256xf32> to vector<16x256xf32>
    %6 = arith.addf %3, %5 : vector<16x256xf32>
    %cst_5 = arith.constant 0.000000e+00 : f32
    %7 = vector.broadcast %cst_5 : f32 to vector<16x256xf32>
    %8 = arith.cmpf ogt, %6, %7 : vector<16x256xf32>
    %cst_6 = arith.constant 2.000000e-01 : f32
    %9 = vector.broadcast %cst_6 : f32 to vector<16x256xf32>
    %10 = arith.mulf %9, %6 : vector<16x256xf32>
    %11 = arith.select %8, %6, %10 : vector<16x256xi1>, vector<16x256xf32>
    %12 = arith.truncf %11 : vector<16x256xf32> to vector<16x256xbf16>
    %c0_7 = arith.constant 0 : index
    %c0_8 = arith.constant 0 : index
    %13 = vector.load %arg4[%c0_7, %c0_8] : memref<256x256xbf16, #tpu.memory_space<vmem>>, vector<256x256xbf16>
    %cst_9 = arith.constant dense<0.000000e+00> : vector<16x256xf32>
    %14 = tpu.matmul %12, %13, %cst_9 {dimension_numbers = #tpu.dot_dimension_numbers<[1], [0], [0], [1], [0, 0, 1, 1], [], []>} : vector<16x256xbf16>, vector<256x256xbf16>, vector<16x256xf32> -> vector<16x256xf32>
    %c0_10 = arith.constant 0 : index
    %c0_11 = arith.constant 0 : index
    %15 = vector.load %arg5[%c0_10, %c0_11] : memref<1x256xf32, #tpu.memory_space<vmem>>, vector<1x256xf32>
    %16 = vector.broadcast %15 : vector<1x256xf32> to vector<16x256xf32>
    %17 = arith.addf %14, %16 : vector<16x256xf32>
    %cst_12 = arith.constant 0.000000e+00 : f32
    %18 = vector.broadcast %cst_12 : f32 to vector<16x256xf32>
    %19 = arith.cmpf ogt, %17, %18 : vector<16x256xf32>
    %cst_13 = arith.constant 2.000000e-01 : f32
    %20 = vector.broadcast %cst_13 : f32 to vector<16x256xf32>
    %21 = arith.mulf %20, %17 : vector<16x256xf32>
    %22 = arith.select %19, %17, %21 : vector<16x256xi1>, vector<16x256xf32>
    %c0_14 = arith.constant 0 : index
    %c0_15 = arith.constant 0 : index
    %23 = vector.load %arg6[%c0_14, %c0_15] : memref<1x256xf32, #tpu.memory_space<vmem>>, vector<1x256xf32>
    %24 = vector.broadcast %23 : vector<1x256xf32> to vector<16x256xf32>
    %25 = arith.mulf %22, %24 : vector<16x256xf32>
    %cst_16 = arith.constant dense<0.000000e+00> : vector<16xf32>
    %26 = vector.multi_reduction <add>, %25, %cst_16 [1] : vector<16x256xf32> to vector<16xf32>
    %27 = vector.shape_cast %26 : vector<16xf32> to vector<16x1xf32>
    %c0_17 = arith.constant 0 : index
    %c0_18 = arith.constant 0 : index
    %28 = vector.load %arg7[%c0_17, %c0_18] : memref<1x1xf32, #tpu.memory_space<vmem>>, vector<1x1xf32>
    %29 = vector.broadcast %28 : vector<1x1xf32> to vector<16x1xf32>
    %30 = arith.addf %27, %29 : vector<16x1xf32>
    %cst_19 = arith.constant 0.000000e+00 : f32
    %31 = vector.broadcast %cst_19 : f32 to vector<16x1xf32>
    %32 = arith.subf %31, %30 : vector<16x1xf32>
    %33 = math.exp %32 : vector<16x1xf32>
    %cst_20 = arith.constant 1.000000e+00 : f32
    %34 = vector.broadcast %cst_20 : f32 to vector<16x1xf32>
    %35 = arith.addf %34, %33 : vector<16x1xf32>
    %36 = tpu.reciprocal %35 {approx = true} : vector<16x1xf32> -> vector<16x1xf32>
    %c0_21 = arith.constant 0 : index
    %c0_22 = arith.constant 0 : index
    %37 = vector.load %arg8[%c0_21, %c0_22] : memref<16x1xf32, #tpu.memory_space<vmem>>, vector<16x1xf32>
    tpu.vector_store %arg8[%c0_21, %c0_22], %36 {strides = array<i32>} : memref<16x1xf32, #tpu.memory_space<vmem>>, vector<16x1xf32>,
    return
  }
  func.func @transform_0(%arg0: i32) -> (i32, i32) {
    %c0_i32 = arith.constant 0 : i32
    %c0_i32_0 = arith.constant 0 : i32
    return %arg0, %c0_i32 : i32, i32
  }
  func.func @transform_1(%arg0: i32) -> (i32, i32) {
    %c0_i32 = arith.constant 0 : i32
    %c0_i32_0 = arith.constant 0 : i32
    %c0_i32_1 = arith.constant 0 : i32
    return %c0_i32, %c0_i32_0 : i32, i32
  }
  func.func @transform_2(%arg0: i32) -> (i32, i32) {
    %c0_i32 = arith.constant 0 : i32
    %c0_i32_0 = arith.constant 0 : i32
    %c0_i32_1 = arith.constant 0 : i32
    return %c0_i32, %c0_i32_0 : i32, i32
  }
  func.func @transform_3(%arg0: i32) -> (i32, i32) {
    %c0_i32 = arith.constant 0 : i32
    %c0_i32_0 = arith.constant 0 : i32
    %c0_i32_1 = arith.constant 0 : i32
    return %c0_i32, %c0_i32_0 : i32, i32
  }
  func.func @transform_4(%arg0: i32) -> (i32, i32) {
    %c0_i32 = arith.constant 0 : i32
    %c0_i32_0 = arith.constant 0 : i32
    %c0_i32_1 = arith.constant 0 : i32
    return %c0_i32, %c0_i32_0 : i32, i32
  }
  func.func @transform_5(%arg0: i32) -> (i32, i32) {
    %c0_i32 = arith.constant 0 : i32
    %c0_i32_0 = arith.constant 0 : i32
    %c0_i32_1 = arith.constant 0 : i32
    return %c0_i32, %c0_i32_0 : i32, i32
  }
  func.func @transform_6(%arg0: i32) -> (i32, i32) {
    %c0_i32 = arith.constant 0 : i32
    %c0_i32_0 = arith.constant 0 : i32
    %c0_i32_1 = arith.constant 0 : i32
    return %c0_i32, %c0_i32_0 : i32, i32
  }
  func.func @transform_7(%arg0: i32) -> (i32, i32) {
    %c0_i32 = arith.constant 0 : i32
    %c0_i32_0 = arith.constant 0 : i32
    return %arg0, %c0_i32 : i32, i32
  }
}

</mosaic_0001>

<bundles_post_ra>
// kernel: discriminator_linear.1
= control target key start
LH: loop header
LB: loop body
LE: loop exit
PB: predicated region body
PF: predicated region fallthrough
CT: control target
= control target key end

     0   :  { %vm1220_vm8 = vcmask 7168   ;;  %s2146_s1 = inlined_call_operand.vmem [shape: bf16[896,256], index: 1, kind: input, shape index: {}]   ;;  %s2147_s0 = inlined_call_operand.vmem [shape: f32[16,896], index: 0, kind: input, shape index: {}]   ;;  %s2148_s3 = inlined_call_operand.vmem [shape: bf16[256,256], index: 3, kind: input, shape index: {}]   ;;  %s2149_s2 = inlined_call_operand.vmem [shape: f32[1,256], index: 2, kind: input, shape index: {}]   ;;  %s2150_s6 = inlined_call_operand.<no memory space> [shape: f32[1,1], index: 6, kind: input, shape index: {}]   ;;  %s2151_s4 = inlined_call_operand.vmem [shape: f32[1,256], index: 4, kind: input, shape index: {}]   ;;  %s2152_s5 = inlined_call_operand.vmem [shape: f32[1,256], index: 5, kind: input, shape index: {}]   ;;  %s2153_s7 = inlined_call_operand.vmem [shape: f32[16,1], index: 7, kind: output, shape index: {}]  }
   0x1   :  { %v1389_v0 = vld [vmem:[%s2146_s1 + $0x104] ss:$8 sps:$4 sm:$0xff]   ;;  %v1391_v1 = vld [vmem:[%s2146_s1 + $0x100] ss:$8 sps:$4 sm:$0xff]   ;;  %v1392_v2 = vld [vmem:[%s2146_s1 + $0x114] ss:$8 sps:$4 sm:$0xff]  }
   0x2   :  { %777 = vmatprep.subr.bf16.mxu0 %v1389_v0  ;;  %v1394_v3 = vld [vmem:[%s2146_s1 + $0x110] ss:$8 sps:$4 sm:$0xff]   ;;  %v1395_v4 = vld [vmem:[%s2146_s1 + $0x124] ss:$8 sps:$4 sm:$0xff]   ;;  %v1397_v5 = vld [vmem:[%s2146_s1 + $0x120] ss:$8 sps:$4 sm:$0xff]  }
   0x3   :  { %778 = vmatpush1.bf16.msra.mxu0 %v1391_v1  ;;  %v1398_v6 = vld [vmem:[%s2146_s1 + $0x134] ss:$8 sps:$4 sm:$0xff]   ;;  %v1400_v7 = vld [vmem:[%s2146_s1 + $0x130] ss:$8 sps:$4 sm:$0xff]   ;;  %v1401_v8 = vld [vmem:[%s2146_s1 + $0x144] ss:$8 sps:$4 sm:$0xff]  }
   0x4   :  { %779 = vmatprep.subr.bf16.mxu0 %v1392_v2  ;;  %v1403_v9 = vld [vmem:[%s2146_s1 + $0x140] ss:$8 sps:$4 sm:$0xff]   ;;  %v1404_v10 = vld [vmem:[%s2146_s1 + $0x154] ss:$8 sps:$4 sm:$0xff]   ;;  %v1406_v11 = vld [vmem:[%s2146_s1 + $0x150] ss:$8 sps:$4 sm:$0xff]  }
   0x5   :  { %v1407_v12 = vld [vmem:[%s2146_s1 + $0x164] ss:$8 sps:$4 sm:$0xff]   ;;  %v32_v13 = vld [vmem:[%s2147_s0 + $0x18] sm:$0xff]  ;;  %v39_v14 = vld [vmem:[%s2147_s0 + $0x50] sm:$0xff] }
   0x6   :  { %v46_v15 = vpack.c.bf16 %v39_v14, %v32_v13  ;;  %v1409_v16 = vld [vmem:[%s2146_s1 + $0x160] ss:$8 sps:$4 sm:$0xff]   ;;  %v1410_v17 = vld [vmem:[%s2146_s1 + $0x174] ss:$8 sps:$4 sm:$0xff]   ;;  %v1412_v18 = vld [vmem:[%s2146_s1 + $0x170] ss:$8 sps:$4 sm:$0xff]  }
   0x7   :  { %780 = vmatpush1.bf16.msra.mxu0 %v1394_v3  ;;  %v1413_v19 = vld [vmem:[%s2146_s1 + $0x184] ss:$8 sps:$4 sm:$0xff]   ;;  %v1415_v20 = vld [vmem:[%s2146_s1 + $0x180] ss:$8 sps:$4 sm:$0xff]   ;;  %v1416_v21 = vld [vmem:[%s2146_s1 + $0x194] ss:$8 sps:$4 sm:$0xff]  }
   0x8   :  { %781 = vmatprep.subr.bf16.mxu0 %v1395_v4  ;;  %809 = vmatprep.mubr.bf16.mxu0 %v46_v15  ;;  %v1458_v22 = vld [vmem:[%s2146_s1 + $0x4] ss:$8 sps:$4 sm:$0xff]   ;;  %v1460_v23 = vld [vmem:[%s2146_s1] ss:$8 sps:$4 sm:$0xff]   ;;  %v1418_v24 = vld [vmem:[%s2146_s1 + $0x190] ss:$8 sps:$4 sm:$0xff]  }
   0x9   :  { %734 = vmatprep.subr.bf16.mxu1 %v1458_v22  ;;  %v1464_v25 = vld [vmem:[%s2146_s1 + $0x14] ss:$8 sps:$4 sm:$0xff]   ;;  %v1466_v26 = vld [vmem:[%s2146_s1 + $0x10] ss:$8 sps:$4 sm:$0xff]   ;;  %v1419_v27 = vld [vmem:[%s2146_s1 + $0x1a4] ss:$8 sps:$4 sm:$0xff]  }
   0xa   :  { %735 = vmatpush1.bf16.msra.mxu1 %v1460_v23  ;;  %v1421_v28 = vld [vmem:[%s2146_s1 + $0x1a0] ss:$8 sps:$4 sm:$0xff]   ;;  %v1470_v29 = vld [vmem:[%s2146_s1 + $0x24] ss:$8 sps:$4 sm:$0xff]   ;;  %v1422_v30 = vld [vmem:[%s2146_s1 + $0x1b4] ss:$8 sps:$4 sm:$0xff]  }
   0xb   :  { %782 = vmatpush1.bf16.msra.mxu0 %v1397_v5  ;;  %736 = vmatprep.subr.bf16.mxu1 %v1464_v25  ;;  %v1472_v31 = vld [vmem:[%s2146_s1 + $0x20] ss:$8 sps:$4 sm:$0xff]   ;;  %v1476_v32 = vld [vmem:[%s2146_s1 + $0x34] ss:$8 sps:$4 sm:$0xff]   ;;  %v1424_v33 = vld [vmem:[%s2146_s1 + $0x1b0] ss:$8 sps:$4 sm:$0xff]  }
   0xc   :  { %783 = vmatprep.subr.bf16.mxu0 %v1398_v6  ;;  %v1425_v34 = vld [vmem:[%s2146_s1 + $0x1c4] ss:$8 sps:$4 sm:$0xff]   ;;  %v1478_v35 = vld [vmem:[%s2146_s1 + $0x30] ss:$8 sps:$4 sm:$0xff]   ;;  %v1427_v37 = vld [vmem:[%s2146_s1 + $0x1c0] ss:$8 sps:$4 sm:$0xff]  }
   0xd   :  { %v1482_v36 = vld [vmem:[%s2146_s1 + $0x44] ss:$8 sps:$4 sm:$0xff]   ;;  %v1428_v38 = vld [vmem:[%s2146_s1 + $0x1d4] ss:$8 sps:$4 sm:$0xff]   ;;  %v1484_v39 = vld [vmem:[%s2146_s1 + $0x40] ss:$8 sps:$4 sm:$0xff]  }
   0xe   :  { %737 = vmatpush1.bf16.msra.mxu1 %v1466_v26  ;;  %v1488_v40 = vld [vmem:[%s2146_s1 + $0x54] ss:$8 sps:$4 sm:$0xff]   ;;  %v1430_v41 = vld [vmem:[%s2146_s1 + $0x1d0] ss:$8 sps:$4 sm:$0xff]   ;;  %v1431_v42 = vld [vmem:[%s2146_s1 + $0x1e4] ss:$8 sps:$4 sm:$0xff]  }
   0xf   :  { %784 = vmatpush1.bf16.msra.mxu0 %v1400_v7  ;;  %738 = vmatprep.subr.bf16.mxu1 %v1470_v29  ;;  %v1490_v43 = vld [vmem:[%s2146_s1 + $0x50] ss:$8 sps:$4 sm:$0xff]   ;;  %v1494_v44 = vld [vmem:[%s2146_s1 + $0x64] ss:$8 sps:$4 sm:$0xff]   ;;  %v1433_v45 = vld [vmem:[%s2146_s1 + $0x1e0] ss:$8 sps:$4 sm:$0xff]  }
  0x10   :  { %785 = vmatprep.subr.bf16.mxu0 %v1401_v8  ;;  %v1434_v46 = vld [vmem:[%s2146_s1 + $0x1f4] ss:$8 sps:$4 sm:$0xff]   ;;  %v1496_v47 = vld [vmem:[%s2146_s1 + $0x60] ss:$8 sps:$4 sm:$0xff]   ;;  %v1436_v49 = vld [vmem:[%s2146_s1 + $0x1f0] ss:$8 sps:$4 sm:$0xff]  }
  0x11   :  { %v1500_v48 = vld [vmem:[%s2146_s1 + $0x74] ss:$8 sps:$4 sm:$0xff]   ;;  %v1439_v50 = vld [vmem:[%s2146_s1 + $0x204] ss:$8 sps:$4 sm:$0xff]   ;;  %v1502_v53 = vld [vmem:[%s2146_s1 + $0x70] ss:$8 sps:$4 sm:$0xff]  }
  0x12   :  { %739 = vmatpush1.bf16.msra.mxu1 %v1472_v31  ;;  %v31_v51 = vld [vmem:[%s2147_s0 + $0x10] sm:$0xff]  ;;  %v38_v52 = vld [vmem:[%s2147_s0 + $0x48] sm:$0xff]  ;;  %v41_v58 = vld [vmem:[%s2147_s0 + $0x60] sm:$0xff] }
  0x13   :  { %786 = vmatpush1.bf16.msra.mxu0 %v1403_v9  ;;  %740 = vmatprep.subr.bf16.mxu1 %v1476_v32  ;;  %v1506_v54 = vld [vmem:[%s2146_s1 + $0x84] ss:$8 sps:$4 sm:$0xff]   ;;  %v1437_v55 = vld [vmem:[%s2146_s1 + $0x200] ss:$8 sps:$4 sm:$0xff]   ;;  %v45_v56 = vpack.c.bf16 %v38_v52, %v31_v51  ;;  %v1442_v59 = vld [vmem:[%s2146_s1 + $0x214] ss:$8 sps:$4 sm:$0xff]  }
  0x14   :  { %787 = vmatprep.subr.bf16.mxu0 %v1404_v10  ;;  %v34_v57 = vld [vmem:[%s2147_s0 + $0x28] sm:$0xff]  ;;  %v1512_v61 = vld [vmem:[%s2146_s1 + $0x94] ss:$8 sps:$4 sm:$0xff]   ;;  %v1440_v63 = vld [vmem:[%s2146_s1 + $0x210] ss:$8 sps:$4 sm:$0xff]  }
  0x15   :  { %v1508_v60 = vld [vmem:[%s2146_s1 + $0x80] ss:$8 sps:$4 sm:$0xff]   ;;  %v48_v62 = vpack.c.bf16 %v41_v58, %v34_v57  ;;  %v1445_v0 = vld [vmem:[%s2146_s1 + $0x224] ss:$8 sps:$4 sm:$0xff]   ;;  %v1514_v1 = vld [vmem:[%s2146_s1 + $0x90] ss:$8 sps:$4 sm:$0xff]  }
  0x16   :  { %741 = vmatpush1.bf16.msra.mxu1 %v1478_v35  ;;  %v1518_v2 = vld [vmem:[%s2146_s1 + $0xa4] ss:$8 sps:$4 sm:$0xff]   ;;  %v1443_v3 = vld [vmem:[%s2146_s1 + $0x220] ss:$8 sps:$4 sm:$0xff]   ;;  %v1448_v4 = vld [vmem:[%s2146_s1 + $0x234] ss:$8 sps:$4 sm:$0xff]  }
  0x17   :  { %788 = vmatpush1.bf16.msra.mxu0 %v1406_v11  ;;  %742 = vmatprep.subr.bf16.mxu1 %v1482_v36  ;;  %v1520_v5 = vld [vmem:[%s2146_s1 + $0xa0] ss:$8 sps:$4 sm:$0xff]   ;;  %v1524_v6 = vld [vmem:[%s2146_s1 + $0xb4] ss:$8 sps:$4 sm:$0xff]   ;;  %v1446_v7 = vld [vmem:[%s2146_s1 + $0x230] ss:$8 sps:$4 sm:$0xff]  }
  0x18   :  { %789 = vmatprep.subr.bf16.mxu0 %v1407_v12  ;;  %v1451_v8 = vld [vmem:[%s2146_s1 + $0x244] ss:$8 sps:$4 sm:$0xff]   ;;  %v1526_v9 = vld [vmem:[%s2146_s1 + $0xb0] ss:$8 sps:$4 sm:$0xff]   ;;  %v1449_v14 = vld [vmem:[%s2146_s1 + $0x240] ss:$8 sps:$4 sm:$0xff]  }
  0x19   :  { %v1530_v10 = vld [vmem:[%s2146_s1 + $0xc4] ss:$8 sps:$4 sm:$0xff]   ;;  %v1532_v15 = vld [vmem:[%s2146_s1 + $0xc0] ss:$8 sps:$4 sm:$0xff]   ;;  %v1548_v25 = vld [vmem:[%s2146_s1 + $0xf4] ss:$8 sps:$4 sm:$0xff]  }
  0x1a   :  { %743 = vmatpush1.bf16.msra.mxu1 %v1484_v39  ;;  %v30_v11 = vld [vmem:[%s2147_s0 + $0x8] sm:$0xff]  ;;  %v37_v12 = vld [vmem:[%s2147_s0 + $0x40] sm:$0xff]  ;;  %v1461_v26 = vld [vmem:[%s2146_s1 + $0x270] ss:$8 sps:$4 sm:$0xff]  }
  0x1b   :  { %790 = vmatpush1.bf16.msra.mxu0 %v1409_v16  ;;  %744 = vmatprep.subr.bf16.mxu1 %v1488_v40  ;;  %v44_v13 = vpack.c.bf16 %v37_v12, %v30_v11  ;;  %v1454_v16 = vld [vmem:[%s2146_s1 + $0x254] ss:$8 sps:$4 sm:$0xff]   ;;  %v1455_v22 = vld [vmem:[%s2146_s1 + $0x260] ss:$8 sps:$4 sm:$0xff]   ;;  %v1559_v31 = vld [vmem:[%s2148_s3 + $0x4] ss:$8 sps:$4 sm:$0xff]  }
  0x1c   :  { %791 = vmatprep.subr.bf16.mxu0 %v1410_v17  ;;  %v1536_v17 = vld [vmem:[%s2146_s1 + $0xd4] ss:$8 sps:$4 sm:$0xff]   ;;  %v1544_v23 = vld [vmem:[%s2146_s1 + $0xe0] ss:$8 sps:$4 sm:$0xff]   ;;  %v1481_v39 = vld [vmem:[%s2146_s1 + $0x2a4] ss:$8 sps:$4 sm:$0xff]  }
  0x1d   :  { %766 = vmatprep.mubr.bf16.mxu1 %v44_v13  ;;  %v36_v29 = vld [vmem:[%s2147_s0 + $0x38] sm:$0xff]  ;;  %v1467_v32 = vld [vmem:[%s2146_s1 + $0x280] ss:$8 sps:$4 sm:$0xff]   ;;  %v1565_v40 = vld [vmem:[%s2148_s3 + $0x24] ss:$8 sps:$4 sm:$0xff]  }
  0x1e   :  { %745 = vmatpush1.bf16.msra.mxu1 %v1490_v43  ;;  %v1557_v35 = vld [vmem:[%s2148_s3] ss:$8 sps:$4 sm:$0xff]   ;;  %v1562_v36 = vld [vmem:[%s2148_s3 + $0x14] ss:$8 sps:$4 sm:$0xff]   ;;  %v1584_v11 = vld [vmem:[%s2148_s3 + $0x90] ss:$8 sps:$4 sm:$0xff]  }
  0x1f   :  { %792 = vmatpush1.bf16.msra.mxu0 %v1412_v18  ;;  %746 = vmatprep.subr.bf16.mxu1 %v1494_v44  ;;  %v1452_v18 = vld [vmem:[%s2146_s1 + $0x250] ss:$8 sps:$4 sm:$0xff]   ;;  %v1487_v43 = vld [vmem:[%s2146_s1 + $0x2b4] ss:$8 sps:$4 sm:$0xff]   ;;  %v1503_v57 = vld [vmem:[%s2146_s1 + $0x2e0] ss:$8 sps:$4 sm:$0xff]  }
  0x20   :  { %793 = vmatprep.subr.bf16.mxu0 %v1413_v19  ;;  %v1538_v19 = vld [vmem:[%s2146_s1 + $0xd0] ss:$8 sps:$4 sm:$0xff]   ;;  %v1568_v44 = vld [vmem:[%s2148_s3 + $0x34] ss:$8 sps:$4 sm:$0xff]   ;;  %v1575_v58 = vld [vmem:[%s2148_s3 + $0x60] ss:$8 sps:$4 sm:$0xff]  }
  0x21   :  { %v1499_v51 = vld [vmem:[%s2146_s1 + $0x2d4] ss:$8 sps:$4 sm:$0xff]   ;;  %v1589_v12 = vld [vmem:[%s2148_s3 + $0xa4] ss:$8 sps:$4 sm:$0xff]   ;;  %v1527_v13 = vld [vmem:[%s2146_s1 + $0x320] ss:$8 sps:$4 sm:$0xff]  }
  0x22   :  { %747 = vmatpush1.bf16.msra.mxu1 %v1496_v47  ;;  %v1493_v47 = vld [vmem:[%s2146_s1 + $0x2c4] ss:$8 sps:$4 sm:$0xff]   ;;  %v1574_v52 = vld [vmem:[%s2148_s3 + $0x54] ss:$8 sps:$4 sm:$0xff]  }
  0x23   :  { %794 = vmatpush1.bf16.msra.mxu0 %v1415_v20  ;;  %748 = vmatprep.subr.bf16.mxu1 %v1500_v48  ;;  %v1457_v20 = vld [vmem:[%s2146_s1 + $0x264] ss:$8 sps:$4 sm:$0xff]  }
  0x24   :  { %795 = vmatprep.subr.bf16.mxu0 %v1416_v21  ;;  %v1542_v21 = vld [vmem:[%s2146_s1 + $0xe4] ss:$8 sps:$4 sm:$0xff]  }
  0x25   :  { %v1571_v48 = vld [vmem:[%s2148_s3 + $0x44] ss:$8 sps:$4 sm:$0xff]  }
  0x26   :  { %749 = vmatpush1.bf16.msra.mxu1 %v1502_v53  ;;  %v1497_v53 = vld [vmem:[%s2146_s1 + $0x2d0] ss:$8 sps:$4 sm:$0xff]  }
  0x27   :  { %796 = vmatpush1.bf16.msra.mxu0 %v1418_v24  ;;  %750 = vmatprep.subr.bf16.mxu1 %v1506_v54  ;;  %v1463_v24 = vld [vmem:[%s2146_s1 + $0x274] ss:$8 sps:$4 sm:$0xff]   ;;  %v1572_v54 = vld [vmem:[%s2148_s3 + $0x50] ss:$8 sps:$4 sm:$0xff]  }
  0x28   :  { %797 = vmatprep.subr.bf16.mxu0 %v1419_v27  ;;  %v1550_v27 = vld [vmem:[%s2146_s1 + $0xf0] ss:$8 sps:$4 sm:$0xff]  }
  0x2a   :  { %751 = vmatpush1.bf16.msra.mxu1 %v1508_v60  ;;  %v1580_v60 = vld [vmem:[%s2148_s3 + $0x74] ss:$8 sps:$4 sm:$0xff]  }
  0x2b   :  { %798 = vmatpush1.bf16.msra.mxu0 %v1421_v28  ;;  %752 = vmatprep.subr.bf16.mxu1 %v1512_v61  ;;  %v29_v28 = vld [vmem:[%s2147_s0] sm:$0xff]  ;;  %v1509_v61 = vld [vmem:[%s2146_s1 + $0x2f0] ss:$8 sps:$4 sm:$0xff]  }
  0x2c   :  { %799 = vmatprep.subr.bf16.mxu0 %v1422_v30  ;;  %v1469_v30 = vld [vmem:[%s2146_s1 + $0x284] ss:$8 sps:$4 sm:$0xff]  }
  0x2e   :  { %753 = vmatpush1.bf16.msra.mxu1 %v1514_v1  ;;  %v1517_v1 = vld [vmem:[%s2146_s1 + $0x304] ss:$8 sps:$4 sm:$0xff]  }
  0x2f   :  { %800 = vmatpush1.bf16.msra.mxu0 %v1424_v33  ;;  %754 = vmatprep.subr.bf16.mxu1 %v1518_v2  ;;  %v1475_v33 = vld [vmem:[%s2146_s1 + $0x294] ss:$8 sps:$4 sm:$0xff]   ;;  %v1583_v2 = vld [vmem:[%s2148_s3 + $0x84] ss:$8 sps:$4 sm:$0xff]  }
  0x30   :  { %801 = vmatprep.subr.bf16.mxu0 %v1425_v34  ;;  %v43_v34 = vpack.c.bf16 %v36_v29, %v29_v28  ;;  %v42_v28 = vld [vmem:[%s2147_s0 + $0x68] sm:$0xff] }
  0x32   :  { %755 = vmatpush1.bf16.msra.mxu1 %v1520_v5  ;;  %v1523_v5 = vld [vmem:[%s2146_s1 + $0x314] ss:$8 sps:$4 sm:$0xff]  }
  0x33   :  { %802 = vmatpush1.bf16.msra.mxu0 %v1427_v37  ;;  %756 = vmatprep.subr.bf16.mxu1 %v1524_v6  ;;  %v1473_v37 = vld [vmem:[%s2146_s1 + $0x290] ss:$8 sps:$4 sm:$0xff]   ;;  %v1581_v6 = vld [vmem:[%s2148_s3 + $0x80] ss:$8 sps:$4 sm:$0xff]  }
  0x34   :  { %803 = vmatprep.subr.bf16.mxu0 %v1428_v38  ;;  %v1560_v38 = vld [vmem:[%s2148_s3 + $0x10] ss:$8 sps:$4 sm:$0xff]  }
  0x36   :  { %757 = vmatpush1.bf16.msra.mxu1 %v1526_v9  ;;  %v1613_v9 = vmov 0  }
  0x37   :  { %804 = vmatpush1.bf16.msra.mxu0 %v1430_v41  ;;  %758 = vmatprep.subr.bf16.mxu1 %v1530_v10  ;;  %v1479_v41 = vld [vmem:[%s2146_s1 + $0x2a0] ss:$8 sps:$4 sm:$0xff]   ;;  %v1529_v10 = vld [vmem:[%s2146_s1 + $0x324] ss:$8 sps:$4 sm:$0xff]  }
  0x38   :  { %805 = vmatprep.subr.bf16.mxu0 %v1431_v42  ;;  %v1563_v42 = vld [vmem:[%s2148_s3 + $0x20] ss:$8 sps:$4 sm:$0xff]  }
  0x3a   :  { %759 = vmatpush1.bf16.msra.mxu1 %v1532_v15  ;;  %v1587_v15 = vld [vmem:[%s2148_s3 + $0xa0] ss:$8 sps:$4 sm:$0xff]  }
  0x3b   :  { %806 = vmatpush1.bf16.msra.mxu0 %v1433_v45  ;;  %760 = vmatprep.subr.bf16.mxu1 %v1536_v17  ;;  %v1485_v45 = vld [vmem:[%s2146_s1 + $0x2b0] ss:$8 sps:$4 sm:$0xff]  }
  0x3c   :  { %807 = vmatprep.subr.bf16.mxu0 %v1434_v46  ;;  %v1566_v46 = vld [vmem:[%s2148_s3 + $0x30] ss:$8 sps:$4 sm:$0xff]  }
  0x3d   :  { %v1533_v17 = vld [vmem:[%s2146_s1 + $0x330] ss:$8 sps:$4 sm:$0xff]  }
  0x3e   :  { %761 = vmatpush1.bf16.msra.mxu1 %v1538_v19  ;;  %v1590_v19 = vld [vmem:[%s2148_s3 + $0xb0] ss:$8 sps:$4 sm:$0xff]  }
  0x3f   :  { %808 = vmatpush1.bf16.msra.mxu0 %v1436_v49  ;;  %762 = vmatprep.subr.bf16.mxu1 %v1542_v21  ;;  %v1491_v49 = vld [vmem:[%s2146_s1 + $0x2c0] ss:$8 sps:$4 sm:$0xff]   ;;  %v1547_v21 = vld [vmem:[%s2146_s1 + $0x354] ss:$8 sps:$4 sm:$0xff]  }
  0x40   :  { %820 = vmatprep.subr.bf16.mxu0 %v1439_v50  ;;  %v1569_v50 = vld [vmem:[%s2148_s3 + $0x40] ss:$8 sps:$4 sm:$0xff]  }
  0x42   :  { %810 = vmatmul.mubr.bf16.vlgmr.msra.gmra.mrb[0].mxu0 %v45_v56  ;;  %763 = vmatpush1.bf16.msra.mxu1 %v1544_v23  ;;  %v1577_v56 = vld [vmem:[%s2148_s3 + $0x64] ss:$8 sps:$4 sm:$0xff]  }
  0x43   :  { %821 = vmatpush1.bf16.msra.mxu0 %v1437_v55  ;;  %852 = vmatprep.mubr.bf16.mxu0 %v48_v62  ;;  %v1505_v55 = vld [vmem:[%s2146_s1 + $0x2e4] ss:$8 sps:$4 sm:$0xff]  }
  0x44   :  { %822 = vmatprep.subr.bf16.mxu0 %v1442_v59  ;;  %764 = vmatprep.subr.bf16.mxu1 %v1548_v25  ;;  %v1511_v59 = vld [vmem:[%s2146_s1 + $0x2f4] ss:$8 sps:$4 sm:$0xff]   ;;  %v33_v62 = vld [vmem:[%s2147_s0 + $0x20] sm:$0xff] }
  0x45   :  { %v1553_v23 = vld [vmem:[%s2146_s1 + $0x364] ss:$8 sps:$4 sm:$0xff]   ;;  %v1556_v25 = vld [vmem:[%s2146_s1 + $0x374] ss:$8 sps:$4 sm:$0xff]  }
  0x46   :  { %765 = vmatpush1.bf16.msra.mxu1 %v1550_v27  ;;  %v35_v27 = vld [vmem:[%s2147_s0 + $0x30] sm:$0xff] }
  0x47   :  { %823 = vmatpush1.bf16.msra.mxu0 %v1440_v63  ;;  %1124 = vmatprep.subr.bf16.mxu1 %v1559_v31  ;;  %v40_v63 = vld [vmem:[%s2147_s0 + $0x58] sm:$0xff]  ;;  %v49_v29 = vpack.c.bf16 %v42_v28, %v35_v27  ;;  %v1595_v31 = vld [vmem:[%s2148_s3 + $0xc4] ss:$8 sps:$4 sm:$0xff]  }
  0x48   :  { %824 = vmatprep.subr.bf16.mxu0 %v1445_v0  ;;  %v1578_v0 = vld [vmem:[%s2148_s3 + $0x70] ss:$8 sps:$4 sm:$0xff]  }
  0x49   :  { %767 = vmatmul.mubr.bf16.vlgmr.msra.gmra.mrb[0].mxu1 %v43_v34  ;;  %v1601_v34 = vld [vmem:[%s2148_s3 + $0xe4] ss:$8 sps:$4 sm:$0xff]  }
  0x4a   :  { %1125 = vmatpush1.bf16.msra.mxu1 %v1557_v35  ;;  %v1599_v35 = vld [vmem:[%s2148_s3 + $0xe0] ss:$8 sps:$4 sm:$0xff]  }
  0x4b   :  { %825 = vmatpush1.bf16.msra.mxu0 %v1443_v3  ;;  %1126 = vmatprep.subr.bf16.mxu1 %v1562_v36  ;;  %v47_v3 = vpack.c.bf16 %v40_v63, %v33_v62  ;;  %v1604_v36 = vld [vmem:[%s2148_s3 + $0xf4] ss:$8 sps:$4 sm:$0xff]  }
  0x4c   :  { %826 = vmatprep.subr.bf16.mxu0 %v1448_v4  ;;  %v1515_v4 = vld [vmem:[%s2146_s1 + $0x300] ss:$8 sps:$4 sm:$0xff]  }
  0x4e   :  { %1127 = vmatpush1.bf16.msra.mxu1 %v1560_v38 }
  0x4f   :  { %827 = vmatpush1.bf16.msra.mxu0 %v1446_v7  ;;  %1128 = vmatprep.subr.bf16.mxu1 %v1565_v40  ;;  %v1586_v7 = vld [vmem:[%s2148_s3 + $0x94] ss:$8 sps:$4 sm:$0xff]  }
  0x50   :  { %828 = vmatprep.subr.bf16.mxu0 %v1451_v8  ;;  %v1521_v8 = vld [vmem:[%s2146_s1 + $0x310] ss:$8 sps:$4 sm:$0xff]  }
  0x52   :  { %1129 = vmatpush1.bf16.msra.mxu1 %v1563_v42  ;;  %v164_v42 = vlaneseq }
  0x53   :  { %829 = vmatpush1.bf16.msra.mxu0 %v1449_v14  ;;  %1130 = vmatprep.subr.bf16.mxu1 %v1568_v44  ;;  %v1535_v14 = vld [vmem:[%s2146_s1 + $0x334] ss:$8 sps:$4 sm:$0xff]  }
  0x54   :  { %830 = vmatprep.subr.bf16.mxu0 %v1454_v16  ;;  %v1592_v16 = vld [vmem:[%s2148_s3 + $0xb4] ss:$8 sps:$4 sm:$0xff]  }
  0x56   :  { %1131 = vmatpush1.bf16.msra.mxu1 %v1566_v46 }
  0x57   :  { %831 = vmatpush1.bf16.msra.mxu0 %v1452_v18  ;;  %1132 = vmatprep.subr.bf16.mxu1 %v1571_v48  ;;  %v1541_v18 = vld [vmem:[%s2146_s1 + $0x344] ss:$8 sps:$4 sm:$0xff]  }
  0x58   :  { %832 = vmatprep.subr.bf16.mxu0 %v1457_v20  ;;  %v1539_v20 = vld [vmem:[%s2146_s1 + $0x340] ss:$8 sps:$4 sm:$0xff]  }
  0x5a   :  { %1133 = vmatpush1.bf16.msra.mxu1 %v1569_v50 }
  0x5b   :  { %833 = vmatpush1.bf16.msra.mxu0 %v1455_v22  ;;  %1134 = vmatprep.subr.bf16.mxu1 %v1574_v52  ;;  %v1545_v22 = vld [vmem:[%s2146_s1 + $0x350] ss:$8 sps:$4 sm:$0xff]  }
  0x5c   :  { %834 = vmatprep.subr.bf16.mxu0 %v1463_v24  ;;  %v1551_v24 = vld [vmem:[%s2146_s1 + $0x360] ss:$8 sps:$4 sm:$0xff]  }
  0x5e   :  { %1135 = vmatpush1.bf16.msra.mxu1 %v1572_v54 }
  0x5f   :  { %835 = vmatpush1.bf16.msra.mxu0 %v1461_v26  ;;  %1136 = vmatprep.subr.bf16.mxu1 %v1577_v56  ;;  %v1554_v26 = vld [vmem:[%s2146_s1 + $0x370] ss:$8 sps:$4 sm:$0xff]  }
  0x60   :  { %836 = vmatprep.subr.bf16.mxu0 %v1469_v30  ;;  %v1593_v30 = vld [vmem:[%s2148_s3 + $0xc0] ss:$8 sps:$4 sm:$0xff]  }
  0x62   :  { %1137 = vmatpush1.bf16.msra.mxu1 %v1575_v58 }
  0x63   :  { %837 = vmatpush1.bf16.msra.mxu0 %v1467_v32  ;;  %1138 = vmatprep.subr.bf16.mxu1 %v1580_v60  ;;  %v1598_v32 = vld [vmem:[%s2148_s3 + $0xd4] ss:$8 sps:$4 sm:$0xff]  }
  0x64   :  { %838 = vmatprep.subr.bf16.mxu0 %v1475_v33  ;;  %v1596_v33 = vld [vmem:[%s2148_s3 + $0xd0] ss:$8 sps:$4 sm:$0xff]  }
  0x66   :  { %1139 = vmatpush1.bf16.msra.mxu1 %v1578_v0 }
  0x67   :  { %839 = vmatpush1.bf16.msra.mxu0 %v1473_v37  ;;  %1140 = vmatprep.subr.bf16.mxu1 %v1583_v2  ;;  %v1602_v37 = vld [vmem:[%s2148_s3 + $0xf0] ss:$8 sps:$4 sm:$0xff]  }
  0x68   :  { %840 = vmatprep.subr.bf16.mxu0 %v1481_v39 }
  0x6a   :  { %1141 = vmatpush1.bf16.msra.mxu1 %v1581_v6 }
  0x6b   :  { %841 = vmatpush1.bf16.msra.mxu0 %v1479_v41  ;;  %1142 = vmatprep.subr.bf16.mxu1 %v1586_v7  ;;  %v12_v7 = vstv %s2150_s6 }
  0x6c   :  { %842 = vmatprep.subr.bf16.mxu0 %v1487_v43  ;;  %v165_v43 = vshrl.u32 %v164_v42, 7  ;;  %13 = vst [vmem:[#allocation2] sm:$0x1] %v12_v7 }
  0x6e   :  { %1143 = vmatpush1.bf16.msra.mxu1 %v1584_v11  ;;  %v166_v44 = vsub.s32 0, %v165_v43  ;;  %v170_v46 = vsub.s32 1, %v165_v43  ;;  %v1179_v11 = vld [vmem:[%s2152_s5] sm:$0x3] }
  0x6f   :  { %843 = vmatpush1.bf16.msra.mxu0 %v1485_v45  ;;  %1144 = vmatprep.subr.bf16.mxu1 %v1589_v12  ;;  %v162_v45 = vld [vmem:[%s2149_s2] sm:$0x3] }
  0x70   :  { %844 = vmatprep.subr.bf16.mxu0 %v1493_v47  ;;  %v167_v47 = vrot.slane %v162_v45, %v166_v44  ;;  %v171_v48 = vrot.slane %v162_v45, %v170_v46 }
  0x72   :  { %1145 = vmatpush1.bf16.msra.mxu1 %v1587_v15 }
  0x73   :  { %845 = vmatpush1.bf16.msra.mxu0 %v1491_v49  ;;  %1146 = vmatprep.subr.bf16.mxu1 %v1592_v16 }
  0x74   :  { %846 = vmatprep.subr.bf16.mxu0 %v1499_v51 }
  0x76   :  { %1147 = vmatpush1.bf16.msra.mxu1 %v1590_v19 }
  0x77   :  { %847 = vmatpush1.bf16.msra.mxu0 %v1497_v53  ;;  %1148 = vmatprep.subr.bf16.mxu1 %v1595_v31 }
  0x78   :  { %848 = vmatprep.subr.bf16.mxu0 %v1505_v55 }
  0x7a   :  { %1149 = vmatpush1.bf16.msra.mxu1 %v1593_v30 }
  0x7b   :  { %849 = vmatpush1.bf16.msra.mxu0 %v1503_v57  ;;  %1150 = vmatprep.subr.bf16.mxu1 %v1598_v32 }
  0x7c   :  { %850 = vmatprep.subr.bf16.mxu0 %v1511_v59 }
  0x7e   :  { %1151 = vmatpush1.bf16.msra.mxu1 %v1596_v33 }
  0x7f   :  { %851 = vmatpush1.bf16.msra.mxu0 %v1509_v61  ;;  %1152 = vmatprep.subr.bf16.mxu1 %v1601_v34 }
  0x80   :  { %863 = vmatprep.subr.bf16.mxu0 %v1517_v1 }
  0x82   :  { %853 = vmatmul.mubr.bf16.vlgmr.msra.gmra.mrb[0].mxu0 %v47_v3  ;;  %1153 = vmatpush1.bf16.msra.mxu1 %v1599_v35 }
  0x83   :  { %864 = vmatpush1.bf16.msra.mxu0 %v1515_v4  ;;  %895 = vmatprep.mubr.bf16.mxu0 %v1613_v9 }
  0x84   :  { %865 = vmatprep.subr.bf16.mxu0 %v1523_v5  ;;  %1154 = vmatprep.subr.bf16.mxu1 %v1604_v36  ;;  %v1371_v36 = vld [vmem:[#allocation2] ss:$0 sm:$0xff] }
  0x86   :  { %1155 = vmatpush1.bf16.msra.mxu1 %v1602_v37 }
  0x87   :  { %866 = vmatpush1.bf16.msra.mxu0 %v1521_v8  ;;  %v952_v8 = vld [vmem:[%s2151_s4] sm:$0x3] }
  0x88   :  { %867 = vmatprep.subr.bf16.mxu0 %v1529_v10  ;;  %v957_v9 = vrot.slane %v952_v8, %v166_v44  ;;  %v961_v10 = vrot.slane %v952_v8, %v170_v46 }
  0x8b   :  { %868 = vmatpush1.bf16.msra.mxu0 %v1527_v13 }
  0x8c   :  { %869 = vmatprep.subr.bf16.mxu0 %v1535_v14 }
  0x8f   :  { %870 = vmatpush1.bf16.msra.mxu0 %v1533_v17  ;;  %v1184_v17 = vrot.slane %v1179_v11, %v166_v44 }
  0x90   :  { %871 = vmatprep.subr.bf16.mxu0 %v1541_v18 }
  0x93   :  { %872 = vmatpush1.bf16.msra.mxu0 %v1539_v20 }
  0x94   :  { %873 = vmatprep.subr.bf16.mxu0 %v1547_v21  ;;  %v1188_v21 = vrot.slane %v1179_v11, %v170_v46 }
  0x97   :  { %874 = vmatpush1.bf16.msra.mxu0 %v1545_v22 }
  0x98   :  { %875 = vmatprep.subr.bf16.mxu0 %v1553_v23 }
  0x9b   :  { %876 = vmatpush1.bf16.msra.mxu0 %v1551_v24 }
  0x9c   :  { %877 = vmatprep.subr.bf16.mxu0 %v1556_v25 }
  0x9f   :  { %878 = vmatpush1.bf16.msra.mxu0 %v1554_v26 }
  0xa2   :  { %896 = vmatmul.mubr.bf16.vlgmr.msra.gmra.mrb[0].mxu0 %v49_v29 }
 0x11c   :  { %v768_v38 = vpop.f32.mrb[0].mxu1 }
 0x11d   :  { %v770_v39 = vpop.f32.mrb[1].mxu1  ;;  %v769_v49 = vadd.f32 %v768_v38, %v167_v47 }
 0x11e   :  { %v772_v40 = vpop.f32.mrb[2].mxu1  ;;  %v771_v50 = vadd.f32 %v770_v39, %v171_v48 }
 0x11f   :  { %v774_v41 = vpop.f32.mrb[3].mxu1  ;;  %v773_v52 = vadd.f32 %v772_v40, %v167_v47 }
 0x120   :  { %v775_v55 = vadd.f32 %v774_v41, %v171_v48 }
 0x175   :  { %v897_v51 = vpop.f32.mrb[0].mxu0 }
 0x176   :  { %v1373_v53 = vadd.f32 %v897_v51, %v769_v49  ;;  %v899_v54 = vpop.f32.mrb[1].mxu0 }
 0x177   :  { %v1375_v56 = vadd.f32 %v899_v54, %v771_v50  ;;  %v901_v57 = vpop.f32.mrb[2].mxu0 }
 0x178   :  { %v910_v58 = vmul.f32 0.2, %v1373_v53  ;;  %v1377_v59 = vadd.f32 %v901_v57, %v773_v52  ;;  %v903_v60 = vpop.f32.mrb[3].mxu0  ;;  %vm906_vm0 = vcmp.gt.f32.partialorder %v1373_v53, 0.0 }
 0x179   :  { %v911_v61 = vmul.f32 0.2, %v1375_v56  ;;  %v1379_v62 = vadd.f32 %v903_v60, %v775_v55  ;;  %vm907_vm1 = vcmp.gt.f32.partialorder %v1375_v56, 0.0 }
 0x17a   :  { %vm908_vm2 = vcmp.gt.f32.partialorder %v1377_v59, 0.0  ;;  %v912_v63 = vmul.f32 0.2, %v1377_v59  ;;  %v914_v1 = vsel %vm906_vm0, %v1373_v53, %v910_v58 }
 0x17b   :  { %vm909_vm3 = vcmp.gt.f32.partialorder %v1379_v62, 0.0  ;;  %v913_v0 = vmul.f32 0.2, %v1379_v62  ;;  %v915_v4 = vsel %vm907_vm1, %v1375_v56, %v911_v61 }
 0x17c   :  { %v916_v2 = vsel %vm908_vm2, %v1377_v59, %v912_v63 }
 0x17d   :  { %v918_v3 = vpack.c.bf16 %v916_v2, %v914_v1  ;;  %v917_v5 = vsel %vm909_vm3, %v1379_v62, %v913_v0 }
 0x17e   :  { %v919_v6 = vpack.c.bf16 %v917_v5, %v915_v4 }
 0x180   :  { %1156 = vmatprep.mubr.bf16.mxu1 %v919_v6 }
 0x181   :  { %1157 = vmatmul.mubr.bf16.vlgmr.msra.gmra.mrb[4].mxu1 %v918_v3 }
 0x254   :  { %v1158_v12 = vpop.f32.mrb[4].mxu1 }
 0x255   :  { %v1159_v13 = vadd.f32 %v1158_v12, %v957_v9  ;;  %v1160_v14 = vpop.f32.mrb[5].mxu1 }
 0x256   :  { %v1161_v15 = vadd.f32 %v1160_v14, %v961_v10  ;;  %v1162_v16 = vpop.f32.mrb[6].mxu1 }
 0x257   :  { %vm1167_vm4 = vcmp.gt.f32.partialorder %v1159_v13, 0.0  ;;  %v1171_v18 = vmul.f32 0.2, %v1159_v13  ;;  %v1163_v19 = vadd.f32 %v1162_v16, %v957_v9  ;;  %v1164_v20 = vpop.f32.mrb[7].mxu1 }
 0x258   :  { %vm1168_vm5 = vcmp.gt.f32.partialorder %v1161_v15, 0.0  ;;  %v1172_v22 = vmul.f32 0.2, %v1161_v15  ;;  %v1165_v23 = vadd.f32 %v1164_v20, %v961_v10 }
 0x259   :  { %vm1169_vm6 = vcmp.gt.f32.partialorder %v1163_v19, 0.0  ;;  %v1173_v24 = vmul.f32 0.2, %v1163_v19  ;;  %v1175_v25 = vsel %vm1167_vm4, %v1159_v13, %v1171_v18 }
 0x25a   :  { %vm1170_vm7 = vcmp.gt.f32.partialorder %v1165_v23, 0.0  ;;  %v1174_v26 = vmul.f32 0.2, %v1165_v23  ;;  %v1176_v27 = vsel %vm1168_vm5, %v1161_v15, %v1172_v22  ;;  %v1191_v28 = vmul.f32 %v1184_v17, %v1175_v25 }
 0x25b   :  { %v1192_v29 = vmul.f32 %v1188_v21, %v1176_v27  ;;  %v1177_v30 = vsel %vm1169_vm6, %v1163_v19, %v1173_v24 }
 0x25c   :  { %v1178_v31 = vsel %vm1170_vm7, %v1165_v23, %v1174_v26  ;;  %v1193_v32 = vmul.f32 %v1184_v17, %v1177_v30 }
 0x25d   :  { %v1195_v33 = vadd.f32 %v1192_v29, %v1191_v28  ;;  %v1194_v34 = vmul.f32 %v1188_v21, %v1178_v31 }
 0x25f   :  { %1196 = vadd.xlane.f32.xlu0 %v1195_v33  ;;  %v1198_v35 = vadd.f32 %v1194_v34, %v1193_v32 }
 0x263   :  { %1199 = vadd.xlane.f32.xlu0 %v1198_v35 }
 0x2ec   :  { %v1197_v37 = vpop.xlane.xlu0 %1196 }
 0x2ed   :  { %v1208_v38 = vadd.f32 %v1371_v36, %v1197_v37 }
 0x2ef   :  { %v1210_v39 = vsub.f32 0.0, %v1208_v38 }
 0x2f0   :  { %v1200_v40 = vpop.xlane.xlu0 %1199 }
 0x2f1   :  { %v1212_v41 = vmul.f32 1.442695, %v1210_v39  ;;  %v1209_v42 = vadd.f32 %v1371_v36, %v1200_v40 }
 0x2f3   :  { %1605 = vpow2.f32 %v1212_v41  ;;  %v1211_v43 = vsub.f32 0.0, %v1209_v42 }
 0x2f5   :  { %v1214_v44 = vmul.f32 1.442695, %v1211_v43 }
 0x2f7   :  { %1607 = vpow2.f32 %v1214_v44 }
 0x2fd   :  { %v1606_v45 = vpop.eup %1605 }
 0x2fe   :  { %v1216_v46 = vadd.f32 1.0, %v1606_v45 }
 0x300   :  { %1609 = vrcp.f32 %v1216_v46 }
 0x301   :  { %v1608_v47 = vpop.eup %1607 }
 0x302   :  { %v1217_v48 = vadd.f32 1.0, %v1608_v47 }
 0x304   :  { %1611 = vrcp.f32 %v1217_v48 }
 0x30a   :  { %v1610_v49 = vpop.eup %1609 }
 0x30b   :  { %1221 = vst.msk [vmem:[%s2153_s7] sm:$0xff] %vm1220_vm8, %v1610_v49 }
 0x30e   :  { %v1612_v50 = vpop.eup %1611 }
 0x30f   :  { %1222 = vst.msk [vmem:[%s2153_s7 + $0x8] sm:$0xff] %vm1220_vm8, %v1612_v50 }

</bundles_post_ra>
